<compile_context>
chip_gen: v6e
topology: v6e:2x2x1
jax: 0.10.0
libtpu: 0.0.40
codegen_flags: <defaults>
</compile_context>

<pallas_src>
import functools

import jax
import jax.numpy as jnp
from jax import lax
from jax.experimental import pallas as pl
from jax.experimental.pallas import tpu as pltpu

_LANES = 128


def _make_dice_kernel(nc_out: int, binary: bool, nrows_pad: int,
                      needs_mask: bool, lane_mask: bool, hw: int, tr: int):
    pad_id = nc_out  # out-of-range class id for invalid pixels

    def kernel(gt_ref, logits_ref, out_ref):
        # gt_ref:     (1, TR, 128)           int8 (or int32 for huge C)
        # logits_ref: (1, C, TR, 128)        original logits dtype (bf16/f32/..)
        # out_ref:    (1, 1, nrows_pad, 128) f32
        gt = gt_ref[0].astype(jnp.int32)     # widen packed gt in vregs
        x = logits_ref[0]                    # keep input dtype (bf16 stays bf16)

        if needs_mask:
            # Mask covers (a) the Pallas-padded rows of a ragged last tile
            # (undefined contents) and (b) the lane tail when H*W % 128 != 0.
            row = lax.broadcasted_iota(jnp.int32, (tr, _LANES), 0)
            base = pl.program_id(1) * tr + row
            if lane_mask:
                lane = lax.broadcasted_iota(jnp.int32, (tr, _LANES), 1)
                valid = (base * _LANES + lane) < hw
            else:
                valid = base < (hw // _LANES)
            gt = jnp.where(valid, gt, pad_id)       # garbage gt never matches

        if binary:
            p = jax.nn.sigmoid(x[0].astype(jnp.float32))          # (TR, 128)
            if needs_mask:
                p = jnp.where(valid, p, 0.0)        # select: NaN-safe
                neg = valid.astype(jnp.float32) - p
            else:
                neg = 1.0 - p
            probas = [neg, p]
            es, inv = None, None
        else:
            # Class-axis max on the raw (possibly bf16) block: exact in bf16,
            # 2x VALU rate for packed types; up-cast happens at subtract/exp.
            m = jnp.max(x, axis=0).astype(jnp.float32)            # (TR, 128)
            if needs_mask:
                # Sanitize BEFORE exp: undefined tail values may be NaN/Inf.
                es = [jnp.exp(jnp.where(valid,
                                        x[c].astype(jnp.float32) - m, 0.0))
                      for c in range(nc_out)]
            else:
                es = [jnp.exp(x[c].astype(jnp.float32) - m)
                      for c in range(nc_out)]
            denom = es[0]
            for c in range(1, nc_out):
                denom = denom + es[c]
            # Approx reciprocal on the EUP + one Newton step: ~f32 accuracy
            # without a full-precision divide on the (saturated) VALU slot.
            inv = pl.reciprocal(denom, approx=True)
            inv = inv * (2.0 - denom * inv)
            if needs_mask:
                # Fold the validity mask into the normalizer once per pixel.
                inv = jnp.where(valid, inv, 0.0)
            probas = None

        for c in range(nc_out):
            p_c = probas[c] if binary else es[c] * inv            # (TR, 128)
            eq = gt == c
            inter = jnp.sum(jnp.where(eq, p_c, 0.0), axis=0, keepdims=True)
            psum = jnp.sum(p_c, axis=0, keepdims=True)
            ohsum = jnp.sum(jnp.where(eq, 1.0, 0.0), axis=0, keepdims=True)
            # Store rows as they are produced: no 3*C live rows + concatenate.
            out_ref[0, 0, pl.ds(c, 1), :] = inter
            out_ref[0, 0, pl.ds(nc_out + c, 1), :] = psum
            out_ref[0, 0, pl.ds(2 * nc_out + c, 1), :] = ohsum

        if nrows_pad > 3 * nc_out:
            out_ref[0, 0, pl.ds(3 * nc_out, nrows_pad - 3 * nc_out), :] = (
                jnp.zeros((nrows_pad - 3 * nc_out, _LANES), jnp.float32))

    return kernel


def _choose_tiling(r: int, num_classes: int, batch: int, tile_rows):
    """Pick TR (spatial rows per tile) and K = number of tiles.

    TR is sized so one f32 copy of a (C, TR, 128) block is ~4 MiB (big tiles
    amortize the ~0.35us per-step cost); TR is kept a multiple of 32 so int8
    gt blocks respect the (32,128) tile.  For B == 1 the spatial extent is
    split into two tiles so both v7x TensorCores get work.  No padding of R
    is needed: the ragged last tile is masked in-kernel.
    """
    if tile_rows is not None:                       # test / tuning hook
        return tile_rows, pl.cdiv(r, tile_rows)
    cap = (4 * 1024 * 1024) // (max(num_classes, 1) * _LANES * 4)
    cap = max(32, min(4096, cap))
    if r <= cap:
        if batch == 1 and r >= 64:                  # keep both v7x cores busy
            tr = pl.cdiv(pl.cdiv(r, 2), 32) * 32
            return tr, pl.cdiv(r, tr)
        return r, 1                                 # single full-extent tile
    tr = (cap // 32) * 32
    return tr, pl.cdiv(r, tr)


@functools.partial(jax.jit, static_argnames=("smooth", "reduction", "tile_rows"))
def dice_loss_v1(gt, logits, smooth=1e-7, weight=None, reduction="mean",
                 tile_rows=None):
    """JAX/Pallas equivalent of DiceLossV1.forward.

    gt:        [B, 1, H, W] integer labels
    logits:    [B, C, H, W] raw logits (kept in original dtype for the DMA)
    tile_rows: optional override of the spatial tile height (multiple of 32)
    """
    B, C, H, W = logits.shape
    HW = H * W
    binary = (C == 1)
    nc_out = 2 if binary else C

    R = pl.cdiv(HW, _LANES)
    HW_pad = R * _LANES
    TR, K = _choose_tiling(R, C, B, tile_rows)
    lane_mask = (HW_pad != HW)
    needs_mask = (K * TR * _LANES != HW)

    gt_dtype = jnp.int8 if nc_out <= 127 else jnp.int32
    gt_flat = gt.astype(gt_dtype).reshape(B, HW)
    logits_flat = logits.reshape(B, C, HW)          # free reshape, no up-cast
    if lane_mask:
        # TODO(synk): this lane pad still copies logits once; it is only hit
        # when H*W % 128 != 0 (the row-ragged last tile needs no pad at all).
        gt_flat = jnp.pad(gt_flat, ((0, 0), (0, HW_pad - HW)))
        logits_flat = jnp.pad(logits_flat, ((0, 0), (0, 0), (0, HW_pad - HW)))
    gt3 = gt_flat.reshape(B, R, _LANES)
    logits4 = logits_flat.reshape(B, C, R, _LANES)

    nrows = 3 * nc_out
    nrows_pad = pl.cdiv(nrows, 8) * 8

    kernel = _make_dice_kernel(nc_out, binary, nrows_pad, needs_mask,
                               lane_mask, HW, TR)

    parts = pl.pallas_call(
        kernel,
        out_shape=jax.ShapeDtypeStruct((B, K, nrows_pad, _LANES), jnp.float32),
        grid=(B, K),
        in_specs=[
            pl.BlockSpec((1, TR, _LANES), lambda b, k: (b, k, 0)),
            pl.BlockSpec((1, C, TR, _LANES), lambda b, k: (b, 0, k, 0)),
        ],
        out_specs=pl.BlockSpec((1, 1, nrows_pad, _LANES),
                               lambda b, k: (b, k, 0, 0)),
        compiler_params=pltpu.CompilerParams(
            dimension_semantics=("parallel", "parallel"),
            vmem_limit_bytes=32 * 1024 * 1024),
    )(gt3, logits4)

    # Cheap JAX epilogue: reduce lane partials + spatial tiles, then the
    # [B, nc] -> scalar dice arithmetic.
    # NOTE: counts are accumulated in f32, so exact integer counting (is_pos,
    # cardinality) is only guaranteed up to ~2^24 pixels.
    sums = jnp.sum(parts, axis=(1, 3))              # (B, nrows_pad)
    inter = sums[:, 0:nc_out]
    prob_sum = sums[:, nc_out:2 * nc_out]
    oh_sum = sums[:, 2 * nc_out:3 * nc_out]
    card = prob_sum + oh_sum
    # count(gt > 0) = HW - count(gt == 0)
    is_pos = (jnp.float32(HW) - oh_sum[:, 0]) > 0.5

    dice_coff = 2.0 * inter / (card + smooth)
    if reduction == "none":
        return jnp.where(is_pos, jnp.mean(dice_coff[:, 1:], axis=1),
                         dice_coff[:, 0])

    dice_loss = 1.0 - dice_coff
    if weight is not None:
        dice_loss = jnp.asarray(weight, jnp.float32) * dice_loss
    per_sample = jnp.where(is_pos, jnp.mean(dice_loss[:, 1:], axis=1),
                           dice_loss[:, 0])
    return jnp.mean(per_sample)


def _reference(gt, logits, smooth=1e-7, weight=None, reduction="mean"):
    """Pure-JAX reference mirroring the PyTorch forward, for sanity checks."""
    B, C, H, W = logits.shape
    gt_i = gt.astype(jnp.int32)[:, 0]               # (B, H, W)
    if C == 1:
        onehot = jax.nn.one_hot(gt_i, 2, dtype=jnp.float32)
        onehot = jnp.transpose(onehot, (0, 3, 1, 2))
        pos_prob = jax.nn.sigmoid(logits.astype(jnp.float32))
        probas = jnp.concatenate([1.0 - pos_prob, pos_prob], axis=1)
    else:
        onehot = jax.nn.one_hot(gt_i, C, dtype=jnp.float32)
        onehot = jnp.transpose(onehot, (0, 3, 1, 2))
        probas = jax.nn.softmax(logits.astype(jnp.float32), axis=1)
    is_pos = jnp.sum(gt_i > 0, axis=(1, 2)) > 0
    inter = jnp.sum(probas * onehot, axis=(2, 3))
    card = jnp.sum(probas + onehot, axis=(2, 3))
    dice = 2.0 * inter / (card + smooth)
    if reduction == "none":
        return jnp.where(is_pos, jnp.mean(dice[:, 1:], axis=1), dice[:, 0])
    loss = 1.0 - dice
    if weight is not None:
        loss = jnp.asarray(weight, jnp.float32) * loss
    return jnp.mean(jnp.where(is_pos, jnp.mean(loss[:, 1:], axis=1), loss[:, 0]))


if __name__ == "__main__":
    key = jax.random.PRNGKey(0)
    keys = jax.random.split(key, 8)

    B, C, H, W = 2, 4, 16, 16

    def check(out, ref, name):
        assert jnp.allclose(out, ref, atol=2e-5, rtol=2e-5), (name, out, ref)

    # gt: batch 0 all background (exercises is_pos=False), batch 1 random.
    gt_b1 = jax.random.randint(keys[0], (1, 1, H, W), 0, C, dtype=jnp.int32)
    gt = jnp.concatenate([jnp.zeros((1, 1, H, W), jnp.int32), gt_b1], axis=0)
    logits = jax.random.normal(keys[1], (B, C, H, W), dtype=jnp.float32)

    # 1. multi-class, f32
    out = jax.block_until_ready(dice_loss_v1(gt, logits))
    check(out, _reference(gt, logits), "f32")

    # 2. multi-class, bf16 logits (no wrapper up-cast; cast happens in vregs)
    logits_bf16 = logits.astype(jnp.bfloat16)
    out_bf = jax.block_until_ready(dice_loss_v1(gt, logits_bf16))
    check(out_bf, _reference(gt, logits_bf16), "bf16")

    # 3. binary (num_classes == 1) path
    gt_bin = (gt > 0).astype(jnp.int32)
    logits_bin = jax.random.normal(keys[2], (B, 1, H, W), dtype=jnp.float32)
    out_bin = jax.block_until_ready(dice_loss_v1(gt_bin, logits_bin))
    check(out_bin, _reference(gt_bin, logits_bin), "binary")

    # 4. H*W not a multiple of 128 (lane mask + wrapper lane pad)
    Hp, Wp = 12, 12
    gt_p = jax.random.randint(keys[3], (B, 1, Hp, Wp), 0, C, dtype=jnp.int32)
    logits_p = jax.random.normal(keys[4], (B, C, Hp, Wp), dtype=jnp.float32)
    out_p = jax.block_until_ready(dice_loss_v1(gt_p, logits_p))
    check(out_p, _reference(gt_p, logits_p), "lane-ragged")

    # 5. row-ragged last tile (K*TR > R, no wrapper pad, in-kernel mask)
    Hr, Wr = 80, 80                      # HW=6400 -> R=50, TR=32 -> K=2
    gt_r = jax.random.randint(keys[5], (B, 1, Hr, Wr), 0, C, dtype=jnp.int32)
    logits_r = jax.random.normal(keys[6], (B, C, Hr, Wr), dtype=jnp.float32)
    out_r = jax.block_until_ready(dice_loss_v1(gt_r, logits_r, tile_rows=32))
    check(out_r, _reference(gt_r, logits_r), "row-ragged")

    # 6. B == 1 auto-split into K = 2 spatial tiles (both v7x cores)
    gt_1 = jax.random.randint(keys[7], (1, 1, 128, 128), 0, C, dtype=jnp.int32)
    logits_1 = jax.random.normal(keys[1], (1, C, 128, 128), dtype=jnp.float32)
    out_1 = jax.block_until_ready(dice_loss_v1(gt_1, logits_1))
    check(out_1, _reference(gt_1, logits_1), "b1-split")

    # 7. weighted + reduction="none" paths
    w = jnp.array((0.5, 1.0, 1.5, 2.0), jnp.float32)
    out_w = jax.block_until_ready(dice_loss_v1(gt, logits, weight=w))
    check(out_w, _reference(gt, logits, weight=w), "weighted")

    out_n = jax.block_until_ready(dice_loss_v1(gt, logits, reduction="none"))
    check(out_n, _reference(gt, logits, reduction="none"), "none")

    print("KERNEL_OK")
</pallas_src>

<mosaic_0001>
module attributes {stable_mosaic.version = 11 : i64} {
  func.func @kernel(%arg0: i32, %arg1: i32, %arg2: memref<1x2x128xi8, #tpu.memory_space<vmem>>, %arg3: memref<1x4x2x128xf32, #tpu.memory_space<vmem>>, %arg4: memref<1x1x16x128xf32, #tpu.memory_space<vmem>>) attributes {dimension_semantics = [#tpu.dimension_semantics<parallel>, #tpu.dimension_semantics<parallel>], iteration_bounds = array<i64: 2, 1>, scalar_prefetch = 0 : i64, scratch_operands = 0 : i64, tpu.core_type = #tpu.core_type<tc>, window_params = [{transform_indices = @transform_0, window_bounds = array<i64: 1, 2, 128>}, {transform_indices = @transform_1, window_bounds = array<i64: 1, 4, 2, 128>}, {transform_indices = @transform_2, window_bounds = array<i64: 1, 1, 16, 128>}]} {
    %c0 = arith.constant 0 : index
    %c0_0 = arith.constant 0 : index
    %c0_1 = arith.constant 0 : index
    %0 = vector.load %arg2[%c0, %c0_0, %c0_1] : memref<1x2x128xi8, #tpu.memory_space<vmem>>, vector<1x2x128xi8>
    %1 = vector.shape_cast %0 : vector<1x2x128xi8> to vector<2x128xi8>
    %2 = arith.extsi %1 : vector<2x128xi8> to vector<2x128xi32>
    %c0_2 = arith.constant 0 : index
    %c0_3 = arith.constant 0 : index
    %c0_4 = arith.constant 0 : index
    %c0_5 = arith.constant 0 : index
    %3 = vector.load %arg3[%c0_2, %c0_3, %c0_4, %c0_5] : memref<1x4x2x128xf32, #tpu.memory_space<vmem>>, vector<1x4x2x128xf32>
    %4 = vector.shape_cast %3 : vector<1x4x2x128xf32> to vector<4x2x128xf32>
    %cst = arith.constant dense<0xFF800000> : vector<2x128xf32>
    %5 = vector.multi_reduction <maximumf>, %4, %cst [0] : vector<4x2x128xf32> to vector<2x128xf32>
    %6 = vector.extract_strided_slice %4 {offsets = [0, 0, 0], sizes = [1, 2, 128], strides = [1, 1, 1]} : vector<4x2x128xf32> to vector<1x2x128xf32>
    %7 = vector.shape_cast %6 : vector<1x2x128xf32> to vector<2x128xf32>
    %8 = arith.subf %7, %5 : vector<2x128xf32>
    %9 = math.exp %8 : vector<2x128xf32>
    %10 = vector.extract_strided_slice %4 {offsets = [1, 0, 0], sizes = [1, 2, 128], strides = [1, 1, 1]} : vector<4x2x128xf32> to vector<1x2x128xf32>
    %11 = vector.shape_cast %10 : vector<1x2x128xf32> to vector<2x128xf32>
    %12 = arith.subf %11, %5 : vector<2x128xf32>
    %13 = math.exp %12 : vector<2x128xf32>
    %14 = vector.extract_strided_slice %4 {offsets = [2, 0, 0], sizes = [1, 2, 128], strides = [1, 1, 1]} : vector<4x2x128xf32> to vector<1x2x128xf32>
    %15 = vector.shape_cast %14 : vector<1x2x128xf32> to vector<2x128xf32>
    %16 = arith.subf %15, %5 : vector<2x128xf32>
    %17 = math.exp %16 : vector<2x128xf32>
    %18 = vector.extract_strided_slice %4 {offsets = [3, 0, 0], sizes = [1, 2, 128], strides = [1, 1, 1]} : vector<4x2x128xf32> to vector<1x2x128xf32>
    %19 = vector.shape_cast %18 : vector<1x2x128xf32> to vector<2x128xf32>
    %20 = arith.subf %19, %5 : vector<2x128xf32>
    %21 = math.exp %20 : vector<2x128xf32>
    %22 = arith.addf %9, %13 : vector<2x128xf32>
    %23 = arith.addf %22, %17 : vector<2x128xf32>
    %24 = arith.addf %23, %21 : vector<2x128xf32>
    %25 = tpu.reciprocal %24 {approx = true} : vector<2x128xf32> -> vector<2x128xf32>
    %26 = arith.mulf %24, %25 : vector<2x128xf32>
    %cst_6 = arith.constant 2.000000e+00 : f32
    %27 = vector.broadcast %cst_6 : f32 to vector<2x128xf32>
    %28 = arith.subf %27, %26 : vector<2x128xf32>
    %29 = arith.mulf %25, %28 : vector<2x128xf32>
    %30 = arith.mulf %9, %29 : vector<2x128xf32>
    %c0_i32 = arith.constant 0 : i32
    %31 = vector.broadcast %c0_i32 : i32 to vector<2x128xi32>
    %32 = arith.cmpi eq, %2, %31 : vector<2x128xi32>
    %cst_7 = arith.constant 0.000000e+00 : f32
    %33 = vector.broadcast %cst_7 : f32 to vector<2x128xf32>
    %34 = arith.select %32, %30, %33 : vector<2x128xi1>, vector<2x128xf32>
    %cst_8 = arith.constant dense<0.000000e+00> : vector<128xf32>
    %35 = vector.multi_reduction <add>, %34, %cst_8 [0] : vector<2x128xf32> to vector<128xf32>
    %36 = vector.shape_cast %35 : vector<128xf32> to vector<1x128xf32>
    %cst_9 = arith.constant dense<0.000000e+00> : vector<128xf32>
    %37 = vector.multi_reduction <add>, %30, %cst_9 [0] : vector<2x128xf32> to vector<128xf32>
    %38 = vector.shape_cast %37 : vector<128xf32> to vector<1x128xf32>
    %cst_10 = arith.constant 1.000000e+00 : f32
    %cst_11 = arith.constant 0.000000e+00 : f32
    %39 = vector.broadcast %cst_10 : f32 to vector<2x128xf32>
    %40 = vector.broadcast %cst_11 : f32 to vector<2x128xf32>
    %41 = arith.select %32, %39, %40 : vector<2x128xi1>, vector<2x128xf32>
    %cst_12 = arith.constant dense<0.000000e+00> : vector<128xf32>
    %42 = vector.multi_reduction <add>, %41, %cst_12 [0] : vector<2x128xf32> to vector<128xf32>
    %43 = vector.shape_cast %42 : vector<128xf32> to vector<1x128xf32>
    %c0_13 = arith.constant 0 : index
    %c0_14 = arith.constant 0 : index
    %c0_15 = arith.constant 0 : index
    %c0_16 = arith.constant 0 : index
    %44 = vector.load %arg4[%c0_13, %c0_14, %c0_15, %c0_16] : memref<1x1x16x128xf32, #tpu.memory_space<vmem>>, vector<1x1x1x128xf32>
    %45 = vector.shape_cast %44 : vector<1x1x1x128xf32> to vector<1x128xf32>
    %46 = vector.shape_cast %36 : vector<1x128xf32> to vector<1x1x1x128xf32>
    tpu.vector_store %arg4[%c0_13, %c0_14, %c0_15, %c0_16], %46 {strides = array<i32>} : memref<1x1x16x128xf32, #tpu.memory_space<vmem>>, vector<1x1x1x128xf32>,
    %c0_17 = arith.constant 0 : index
    %c0_18 = arith.constant 0 : index
    %c4 = arith.constant 4 : index
    %c0_19 = arith.constant 0 : index
    %47 = vector.load %arg4[%c0_17, %c0_18, %c4, %c0_19] : memref<1x1x16x128xf32, #tpu.memory_space<vmem>>, vector<1x1x1x128xf32>
    %48 = vector.shape_cast %47 : vector<1x1x1x128xf32> to vector<1x128xf32>
    %49 = vector.shape_cast %38 : vector<1x128xf32> to vector<1x1x1x128xf32>
    tpu.vector_store %arg4[%c0_17, %c0_18, %c4, %c0_19], %49 {strides = array<i32>} : memref<1x1x16x128xf32, #tpu.memory_space<vmem>>, vector<1x1x1x128xf32>,
    %c0_20 = arith.constant 0 : index
    %c0_21 = arith.constant 0 : index
    %c8 = arith.constant 8 : index
    %c0_22 = arith.constant 0 : index
    %50 = vector.load %arg4[%c0_20, %c0_21, %c8, %c0_22] : memref<1x1x16x128xf32, #tpu.memory_space<vmem>>, vector<1x1x1x128xf32>
    %51 = vector.shape_cast %50 : vector<1x1x1x128xf32> to vector<1x128xf32>
    %52 = vector.shape_cast %43 : vector<1x128xf32> to vector<1x1x1x128xf32>
    tpu.vector_store %arg4[%c0_20, %c0_21, %c8, %c0_22], %52 {strides = array<i32>} : memref<1x1x16x128xf32, #tpu.memory_space<vmem>>, vector<1x1x1x128xf32>,
    %53 = arith.mulf %13, %29 : vector<2x128xf32>
    %c1_i32 = arith.constant 1 : i32
    %54 = vector.broadcast %c1_i32 : i32 to vector<2x128xi32>
    %55 = arith.cmpi eq, %2, %54 : vector<2x128xi32>
    %cst_23 = arith.constant 0.000000e+00 : f32
    %56 = vector.broadcast %cst_23 : f32 to vector<2x128xf32>
    %57 = arith.select %55, %53, %56 : vector<2x128xi1>, vector<2x128xf32>
    %cst_24 = arith.constant dense<0.000000e+00> : vector<128xf32>
    %58 = vector.multi_reduction <add>, %57, %cst_24 [0] : vector<2x128xf32> to vector<128xf32>
    %59 = vector.shape_cast %58 : vector<128xf32> to vector<1x128xf32>
    %cst_25 = arith.constant dense<0.000000e+00> : vector<128xf32>
    %60 = vector.multi_reduction <add>, %53, %cst_25 [0] : vector<2x128xf32> to vector<128xf32>
    %61 = vector.shape_cast %60 : vector<128xf32> to vector<1x128xf32>
    %cst_26 = arith.constant 1.000000e+00 : f32
    %cst_27 = arith.constant 0.000000e+00 : f32
    %62 = vector.broadcast %cst_26 : f32 to vector<2x128xf32>
    %63 = vector.broadcast %cst_27 : f32 to vector<2x128xf32>
    %64 = arith.select %55, %62, %63 : vector<2x128xi1>, vector<2x128xf32>
    %cst_28 = arith.constant dense<0.000000e+00> : vector<128xf32>
    %65 = vector.multi_reduction <add>, %64, %cst_28 [0] : vector<2x128xf32> to vector<128xf32>
    %66 = vector.shape_cast %65 : vector<128xf32> to vector<1x128xf32>
    %c0_29 = arith.constant 0 : index
    %c0_30 = arith.constant 0 : index
    %c1 = arith.constant 1 : index
    %c0_31 = arith.constant 0 : index
    %67 = vector.load %arg4[%c0_29, %c0_30, %c1, %c0_31] : memref<1x1x16x128xf32, #tpu.memory_space<vmem>>, vector<1x1x1x128xf32>
    %68 = vector.shape_cast %67 : vector<1x1x1x128xf32> to vector<1x128xf32>
    %69 = vector.shape_cast %59 : vector<1x128xf32> to vector<1x1x1x128xf32>
    tpu.vector_store %arg4[%c0_29, %c0_30, %c1, %c0_31], %69 {strides = array<i32>} : memref<1x1x16x128xf32, #tpu.memory_space<vmem>>, vector<1x1x1x128xf32>,
    %c0_32 = arith.constant 0 : index
    %c0_33 = arith.constant 0 : index
    %c5 = arith.constant 5 : index
    %c0_34 = arith.constant 0 : index
    %70 = vector.load %arg4[%c0_32, %c0_33, %c5, %c0_34] : memref<1x1x16x128xf32, #tpu.memory_space<vmem>>, vector<1x1x1x128xf32>
    %71 = vector.shape_cast %70 : vector<1x1x1x128xf32> to vector<1x128xf32>
    %72 = vector.shape_cast %61 : vector<1x128xf32> to vector<1x1x1x128xf32>
    tpu.vector_store %arg4[%c0_32, %c0_33, %c5, %c0_34], %72 {strides = array<i32>} : memref<1x1x16x128xf32, #tpu.memory_space<vmem>>, vector<1x1x1x128xf32>,
    %c0_35 = arith.constant 0 : index
    %c0_36 = arith.constant 0 : index
    %c9 = arith.constant 9 : index
    %c0_37 = arith.constant 0 : index
    %73 = vector.load %arg4[%c0_35, %c0_36, %c9, %c0_37] : memref<1x1x16x128xf32, #tpu.memory_space<vmem>>, vector<1x1x1x128xf32>
    %74 = vector.shape_cast %73 : vector<1x1x1x128xf32> to vector<1x128xf32>
    %75 = vector.shape_cast %66 : vector<1x128xf32> to vector<1x1x1x128xf32>
    tpu.vector_store %arg4[%c0_35, %c0_36, %c9, %c0_37], %75 {strides = array<i32>} : memref<1x1x16x128xf32, #tpu.memory_space<vmem>>, vector<1x1x1x128xf32>,
    %76 = arith.mulf %17, %29 : vector<2x128xf32>
    %c2_i32 = arith.constant 2 : i32
    %77 = vector.broadcast %c2_i32 : i32 to vector<2x128xi32>
    %78 = arith.cmpi eq, %2, %77 : vector<2x128xi32>
    %cst_38 = arith.constant 0.000000e+00 : f32
    %79 = vector.broadcast %cst_38 : f32 to vector<2x128xf32>
    %80 = arith.select %78, %76, %79 : vector<2x128xi1>, vector<2x128xf32>
    %cst_39 = arith.constant dense<0.000000e+00> : vector<128xf32>
    %81 = vector.multi_reduction <add>, %80, %cst_39 [0] : vector<2x128xf32> to vector<128xf32>
    %82 = vector.shape_cast %81 : vector<128xf32> to vector<1x128xf32>
    %cst_40 = arith.constant dense<0.000000e+00> : vector<128xf32>
    %83 = vector.multi_reduction <add>, %76, %cst_40 [0] : vector<2x128xf32> to vector<128xf32>
    %84 = vector.shape_cast %83 : vector<128xf32> to vector<1x128xf32>
    %cst_41 = arith.constant 1.000000e+00 : f32
    %cst_42 = arith.constant 0.000000e+00 : f32
    %85 = vector.broadcast %cst_41 : f32 to vector<2x128xf32>
    %86 = vector.broadcast %cst_42 : f32 to vector<2x128xf32>
    %87 = arith.select %78, %85, %86 : vector<2x128xi1>, vector<2x128xf32>
    %cst_43 = arith.constant dense<0.000000e+00> : vector<128xf32>
    %88 = vector.multi_reduction <add>, %87, %cst_43 [0] : vector<2x128xf32> to vector<128xf32>
    %89 = vector.shape_cast %88 : vector<128xf32> to vector<1x128xf32>
    %c0_44 = arith.constant 0 : index
    %c0_45 = arith.constant 0 : index
    %c2 = arith.constant 2 : index
    %c0_46 = arith.constant 0 : index
    %90 = vector.load %arg4[%c0_44, %c0_45, %c2, %c0_46] : memref<1x1x16x128xf32, #tpu.memory_space<vmem>>, vector<1x1x1x128xf32>
    %91 = vector.shape_cast %90 : vector<1x1x1x128xf32> to vector<1x128xf32>
    %92 = vector.shape_cast %82 : vector<1x128xf32> to vector<1x1x1x128xf32>
    tpu.vector_store %arg4[%c0_44, %c0_45, %c2, %c0_46], %92 {strides = array<i32>} : memref<1x1x16x128xf32, #tpu.memory_space<vmem>>, vector<1x1x1x128xf32>,
    %c0_47 = arith.constant 0 : index
    %c0_48 = arith.constant 0 : index
    %c6 = arith.constant 6 : index
    %c0_49 = arith.constant 0 : index
    %93 = vector.load %arg4[%c0_47, %c0_48, %c6, %c0_49] : memref<1x1x16x128xf32, #tpu.memory_space<vmem>>, vector<1x1x1x128xf32>
    %94 = vector.shape_cast %93 : vector<1x1x1x128xf32> to vector<1x128xf32>
    %95 = vector.shape_cast %84 : vector<1x128xf32> to vector<1x1x1x128xf32>
    tpu.vector_store %arg4[%c0_47, %c0_48, %c6, %c0_49], %95 {strides = array<i32>} : memref<1x1x16x128xf32, #tpu.memory_space<vmem>>, vector<1x1x1x128xf32>,
    %c0_50 = arith.constant 0 : index
    %c0_51 = arith.constant 0 : index
    %c10 = arith.constant 10 : index
    %c0_52 = arith.constant 0 : index
    %96 = vector.load %arg4[%c0_50, %c0_51, %c10, %c0_52] : memref<1x1x16x128xf32, #tpu.memory_space<vmem>>, vector<1x1x1x128xf32>
    %97 = vector.shape_cast %96 : vector<1x1x1x128xf32> to vector<1x128xf32>
    %98 = vector.shape_cast %89 : vector<1x128xf32> to vector<1x1x1x128xf32>
    tpu.vector_store %arg4[%c0_50, %c0_51, %c10, %c0_52], %98 {strides = array<i32>} : memref<1x1x16x128xf32, #tpu.memory_space<vmem>>, vector<1x1x1x128xf32>,
    %99 = arith.mulf %21, %29 : vector<2x128xf32>
    %c3_i32 = arith.constant 3 : i32
    %100 = vector.broadcast %c3_i32 : i32 to vector<2x128xi32>
    %101 = arith.cmpi eq, %2, %100 : vector<2x128xi32>
    %cst_53 = arith.constant 0.000000e+00 : f32
    %102 = vector.broadcast %cst_53 : f32 to vector<2x128xf32>
    %103 = arith.select %101, %99, %102 : vector<2x128xi1>, vector<2x128xf32>
    %cst_54 = arith.constant dense<0.000000e+00> : vector<128xf32>
    %104 = vector.multi_reduction <add>, %103, %cst_54 [0] : vector<2x128xf32> to vector<128xf32>
    %105 = vector.shape_cast %104 : vector<128xf32> to vector<1x128xf32>
    %cst_55 = arith.constant dense<0.000000e+00> : vector<128xf32>
    %106 = vector.multi_reduction <add>, %99, %cst_55 [0] : vector<2x128xf32> to vector<128xf32>
    %107 = vector.shape_cast %106 : vector<128xf32> to vector<1x128xf32>
    %cst_56 = arith.constant 1.000000e+00 : f32
    %cst_57 = arith.constant 0.000000e+00 : f32
    %108 = vector.broadcast %cst_56 : f32 to vector<2x128xf32>
    %109 = vector.broadcast %cst_57 : f32 to vector<2x128xf32>
    %110 = arith.select %101, %108, %109 : vector<2x128xi1>, vector<2x128xf32>
    %cst_58 = arith.constant dense<0.000000e+00> : vector<128xf32>
    %111 = vector.multi_reduction <add>, %110, %cst_58 [0] : vector<2x128xf32> to vector<128xf32>
    %112 = vector.shape_cast %111 : vector<128xf32> to vector<1x128xf32>
    %c0_59 = arith.constant 0 : index
    %c0_60 = arith.constant 0 : index
    %c3 = arith.constant 3 : index
    %c0_61 = arith.constant 0 : index
    %113 = vector.load %arg4[%c0_59, %c0_60, %c3, %c0_61] : memref<1x1x16x128xf32, #tpu.memory_space<vmem>>, vector<1x1x1x128xf32>
    %114 = vector.shape_cast %113 : vector<1x1x1x128xf32> to vector<1x128xf32>
    %115 = vector.shape_cast %105 : vector<1x128xf32> to vector<1x1x1x128xf32>
    tpu.vector_store %arg4[%c0_59, %c0_60, %c3, %c0_61], %115 {strides = array<i32>} : memref<1x1x16x128xf32, #tpu.memory_space<vmem>>, vector<1x1x1x128xf32>,
    %c0_62 = arith.constant 0 : index
    %c0_63 = arith.constant 0 : index
    %c7 = arith.constant 7 : index
    %c0_64 = arith.constant 0 : index
    %116 = vector.load %arg4[%c0_62, %c0_63, %c7, %c0_64] : memref<1x1x16x128xf32, #tpu.memory_space<vmem>>, vector<1x1x1x128xf32>
    %117 = vector.shape_cast %116 : vector<1x1x1x128xf32> to vector<1x128xf32>
    %118 = vector.shape_cast %107 : vector<1x128xf32> to vector<1x1x1x128xf32>
    tpu.vector_store %arg4[%c0_62, %c0_63, %c7, %c0_64], %118 {strides = array<i32>} : memref<1x1x16x128xf32, #tpu.memory_space<vmem>>, vector<1x1x1x128xf32>,
    %c0_65 = arith.constant 0 : index
    %c0_66 = arith.constant 0 : index
    %c11 = arith.constant 11 : index
    %c0_67 = arith.constant 0 : index
    %119 = vector.load %arg4[%c0_65, %c0_66, %c11, %c0_67] : memref<1x1x16x128xf32, #tpu.memory_space<vmem>>, vector<1x1x1x128xf32>
    %120 = vector.shape_cast %119 : vector<1x1x1x128xf32> to vector<1x128xf32>
    %121 = vector.shape_cast %112 : vector<1x128xf32> to vector<1x1x1x128xf32>
    tpu.vector_store %arg4[%c0_65, %c0_66, %c11, %c0_67], %121 {strides = array<i32>} : memref<1x1x16x128xf32, #tpu.memory_space<vmem>>, vector<1x1x1x128xf32>,
    %cst_68 = arith.constant 0.000000e+00 : f32
    %122 = vector.broadcast %cst_68 : f32 to vector<4x128xf32>
    %c0_69 = arith.constant 0 : index
    %c0_70 = arith.constant 0 : index
    %c12 = arith.constant 12 : index
    %c0_71 = arith.constant 0 : index
    %123 = vector.load %arg4[%c0_69, %c0_70, %c12, %c0_71] : memref<1x1x16x128xf32, #tpu.memory_space<vmem>>, vector<1x1x4x128xf32>
    %124 = vector.shape_cast %123 : vector<1x1x4x128xf32> to vector<4x128xf32>
    %125 = vector.shape_cast %122 : vector<4x128xf32> to vector<1x1x4x128xf32>
    tpu.vector_store %arg4[%c0_69, %c0_70, %c12, %c0_71], %125 {strides = array<i32>} : memref<1x1x16x128xf32, #tpu.memory_space<vmem>>, vector<1x1x4x128xf32>,
    return
  }
  func.func @transform_0(%arg0: i32, %arg1: i32) -> (i32, i32, i32) {
    %c0_i32 = arith.constant 0 : i32
    %c0_i32_0 = arith.constant 0 : i32
    return %arg0, %arg1, %c0_i32 : i32, i32, i32
  }
  func.func @transform_1(%arg0: i32, %arg1: i32) -> (i32, i32, i32, i32) {
    %c0_i32 = arith.constant 0 : i32
    %c0_i32_0 = arith.constant 0 : i32
    %c0_i32_1 = arith.constant 0 : i32
    return %arg0, %c0_i32, %arg1, %c0_i32_0 : i32, i32, i32, i32
  }
  func.func @transform_2(%arg0: i32, %arg1: i32) -> (i32, i32, i32, i32) {
    %c0_i32 = arith.constant 0 : i32
    %c0_i32_0 = arith.constant 0 : i32
    %c0_i32_1 = arith.constant 0 : i32
    return %arg0, %arg1, %c0_i32, %c0_i32_0 : i32, i32, i32, i32
  }
}

</mosaic_0001>

<bundles_post_ra>
// kernel: dice_loss_v1.1
= control target key start
LH: loop header
LB: loop body
LE: loop exit
PB: predicated region body
PF: predicated region fallthrough
CT: control target
= control target key end

     0   :  { %s537_s9 = smov 0   ;;  %s539_s10 = smov 0   ;;  %s626_s0 = inlined_call_operand.vmem [shape: s8[2,2,128], index: 0, kind: input, shape index: {}]   ;;  %s627_s1 = inlined_call_operand.vmem [shape: f32[2,4,2,128], index: 1, kind: input, shape index: {}]   ;;  %s628_s2 = inlined_call_operand.vmem [shape: f32[2,1,16,128], index: 2, kind: output, shape index: {}]  }
   0x1   :  { %s541_s11 = smov 0  }
   0x2 LB: > { %s24_s12 = sadd.s32 1, %s515_s10  ;;  %p453_p0 = scmp.ge.s32.totalorder %s519_s11, 1  ;;  %s519_s11 = sphi %s541_s11, %s12_s11   ;;  %s515_s10 = sphi %s539_s10, %s630_s10   ;;  %s511_s9 = sphi %s537_s9, %s629_s9  }
   0x3   : > { %p26_p1 = scmp.ge.s32.totalorder %s24_s12, 2  ;;  %p144_p2 = scmp.lt.s32.totalorder %s519_s11, 3 }
   0x5   : > { %s632_s12 = smov (%p26_p1, %s24_s12), 0  ;;  %p145_p3 = pnand %p453_p0, %p144_p2 }
   0x6   : > { %p179_p4 = scmp.lt.s32.totalorder (!%p145_p3), %s511_s9, 1 }
   0x7   : > { %148 = sbr.rel (%p145_p3) target bundleno = 91 (0x5b), region = 28 }
   0xc   : > { %s634_s9 = smov (!%p179_p4, %s511_s9), 1  ;;  %vm208_vm0 = vcmask 1041408   ;;  %v521_v9 = vmov 0.0  }
   0xd   : > { %s184_s15 = scalar_lea.vmem %s626_s0, %s634_s9  ;;  %s460_s16 = sshll.u32 %s634_s9, 3 }
   0xe   : > { %s192_s19 = scalar_lea.vmem %s627_s1, %s460_s16  ;;  %s461_s20 = sshll.u32 %s634_s9, 4  ;;  %v202_v0 = vld [vmem:[%s184_s15] sm:$0x1] }
   0xf   : > { %s564_s23 = scalar_lea.vmem %s628_s2, %s461_s20  ;;  %v566_v1 = vunpack.c.0.s8 %v202_v0  ;;  %v204_v2 = vld [vmem:[%s192_s19] sm:$0x3]  ;;  %v205_v3 = vld [vmem:[%s192_s19 + $0x2] sm:$0x3]  ;;  %v206_v4 = vld [vmem:[%s192_s19 + $0x4] sm:$0x3] }
  0x10   : > { %v207_v5 = vld [vmem:[%s192_s19 + $0x6] sm:$0x3]  ;;  %v209_v6 = vsel %vm208_vm0, %v204_v2, -inf  ;;  %v210_v7 = vsel %vm208_vm0, %v205_v3, -inf  ;;  %v211_v8 = vsel %vm208_vm0, %v206_v4, -inf }
  0x11   : > { %347 = vst [vmem:[%s564_s23 + $0xc] sm:$0xf] %v521_v9  ;;  %v212_v10 = vsel %vm208_vm0, %v207_v5, -inf  ;;  %v213_v11 = vmax.f32 %v209_v6, %v210_v7  ;;  %vm236_vm1 = vcmp.eq.s32.totalorder %v566_v1, 0  ;;  %vm264_vm2 = vcmp.eq.s32.totalorder %v566_v1, 1 }
  0x12   : > { %v214_v12 = vmax.f32 %v211_v8, %v212_v10  ;;  %v252_v13 = vsel %vm236_vm1, 1.0, %v521_v9  ;;  %v280_v14 = vsel %vm264_vm2, 1.0, %v521_v9  ;;  %vm292_vm3 = vcmp.eq.s32.totalorder %v566_v1, 2 }
  0x13   : > { %v253_v15 = vsel %vm208_vm0, %v252_v13, 0.0  ;;  %v281_v16 = vsel %vm208_vm0, %v280_v14, 0.0  ;;  %v308_v17 = vsel %vm292_vm3, 1.0, %v521_v9  ;;  %vm320_vm4 = vcmp.eq.s32.totalorder %v566_v1, 3 }
  0x14   : > { %v215_v18 = vmax.f32 %v213_v11, %v214_v12  ;;  %v254_v19 = vrot.slane %v253_v15, 4  ;;  %v282_v20 = vrot.slane %v281_v16, 4  ;;  %v309_v21 = vsel %vm208_vm0, %v308_v17, 0.0 }
  0x15   : > { %v310_v22 = vrot.slane %v309_v21, 4  ;;  %v336_v23 = vsel %vm320_vm4, 1.0, %v521_v9 }
  0x16   : > { %v216_v24 = vsub.f32 %v204_v2, %v215_v18  ;;  %v219_v25 = vsub.f32 %v205_v3, %v215_v18  ;;  %v222_v26 = vsub.f32 %v206_v4, %v215_v18  ;;  %v225_v27 = vsub.f32 %v207_v5, %v215_v18 }
  0x17   : > { %v255_v28 = vadd.f32 %v254_v19, %v253_v15  ;;  %v283_v29 = vadd.f32 %v282_v20, %v281_v16  ;;  %v311_v30 = vadd.f32 %v310_v22, %v309_v21  ;;  %v337_v31 = vsel %vm208_vm0, %v336_v23, 0.0 }
  0x18   : > { %v217_v32 = vmul.f32 1.442695, %v216_v24  ;;  %v220_v33 = vmul.f32 1.442695, %v219_v25  ;;  %v223_v34 = vmul.f32 1.442695, %v222_v26 }
  0x19   : > { %v226_v35 = vmul.f32 1.442695, %v225_v27  ;;  %v256_v36 = vrot.slane %v255_v28, 2  ;;  %v284_v37 = vrot.slane %v283_v29, 2  ;;  %v312_v38 = vrot.slane %v311_v30, 2 }
  0x1a   : > { %487 = vpow2.f32 %v217_v32  ;;  %v338_v39 = vrot.slane %v337_v31, 4 }
  0x1b   : > { %489 = vpow2.f32 %v220_v33  ;;  %v257_v40 = vadd.f32 %v256_v36, %v255_v28  ;;  %v285_v41 = vadd.f32 %v284_v37, %v283_v29  ;;  %v313_v42 = vadd.f32 %v312_v38, %v311_v30 }
  0x1c   : > { %491 = vpow2.f32 %v223_v34  ;;  %v339_v43 = vadd.f32 %v338_v39, %v337_v31 }
  0x1d   : > { %493 = vpow2.f32 %v226_v35  ;;  %v258_v44 = vrot.slane %v257_v40, 1  ;;  %v286_v45 = vrot.slane %v285_v41, 1  ;;  %v314_v46 = vrot.slane %v313_v42, 1 }
  0x1e   : > { %v340_v47 = vrot.slane %v339_v43, 2 }
  0x1f   : > { %v259_v48 = vadd.f32 %v258_v44, %v257_v40  ;;  %v287_v49 = vadd.f32 %v286_v45, %v285_v41  ;;  %v315_v50 = vadd.f32 %v314_v46, %v313_v42 }
  0x20   : > { %v341_v51 = vadd.f32 %v340_v47, %v339_v43 }
  0x21   : > { %262 = vst [vmem:[%s564_s23 + $0x8] sm:$0x1] %v259_v48  ;;  %290 = vst [vmem:[%s564_s23 + $0x9] sm:$0x1] %v287_v49 }
  0x22   : > { %318 = vst [vmem:[%s564_s23 + $0xa] sm:$0x1] %v315_v50  ;;  %v342_v52 = vrot.slane %v341_v51, 1 }
  0x24   : > { %v343_v53 = vadd.f32 %v342_v52, %v341_v51 }
  0x26   : > { %346 = vst [vmem:[%s564_s23 + $0xb] sm:$0x1] %v343_v53 }
  0x27   : > { %v488_v54 = vpop.eup %487 }
  0x28   : > { %v490_v55 = vpop.eup %489 }
  0x29   : > { %v492_v56 = vpop.eup %491  ;;  %v228_v57 = vadd.f32 %v490_v55, %v488_v54 }
  0x2a   : > { %v494_v58 = vpop.eup %493 }
  0x2b   : > { %v229_v59 = vadd.f32 %v492_v56, %v228_v57 }
  0x2d   : > { %v230_v60 = vadd.f32 %v494_v58, %v229_v59 }
  0x2f   : > { %495 = vrcp.f32 %v230_v60 }
  0x3c   : > { %v496_v61 = vpop.eup %495 }
  0x3d   : > { %v232_v62 = vmul.f32 %v496_v61, %v230_v60 }
  0x3f   : > { %v233_v63 = vsub.f32 2.0, %v232_v62 }
  0x41   : > { %v234_v0 = vmul.f32 %v496_v61, %v233_v63 }
  0x43   : > { %v235_v2 = vmul.f32 %v488_v54, %v234_v0  ;;  %v263_v3 = vmul.f32 %v490_v55, %v234_v0  ;;  %v291_v4 = vmul.f32 %v492_v56, %v234_v0  ;;  %v319_v5 = vmul.f32 %v494_v58, %v234_v0 }
  0x45   : > { %v237_v6 = vsel %vm236_vm1, %v235_v2, 0.0  ;;  %v245_v7 = vsel %vm208_vm0, %v235_v2, 0.0  ;;  %v265_v8 = vsel %vm264_vm2, %v263_v3, 0.0  ;;  %v273_v9 = vsel %vm208_vm0, %v263_v3, 0.0 }
  0x46   : > { %v238_v10 = vsel %vm208_vm0, %v237_v6, 0.0  ;;  %v246_v11 = vrot.slane %v245_v7, 4  ;;  %v266_v12 = vsel %vm208_vm0, %v265_v8, 0.0  ;;  %v274_v13 = vrot.slane %v273_v9, 4 }
  0x47   : > { %v239_v14 = vrot.slane %v238_v10, 4  ;;  %v267_v15 = vrot.slane %v266_v12, 4  ;;  %v293_v16 = vsel %vm292_vm3, %v291_v4, 0.0  ;;  %v301_v17 = vsel %vm208_vm0, %v291_v4, 0.0 }
  0x48   : > { %v247_v18 = vadd.f32 %v246_v11, %v245_v7  ;;  %v275_v19 = vadd.f32 %v274_v13, %v273_v9  ;;  %v294_v20 = vsel %vm208_vm0, %v293_v16, 0.0  ;;  %v302_v21 = vrot.slane %v301_v17, 4 }
  0x49   : > { %v240_v22 = vadd.f32 %v239_v14, %v238_v10  ;;  %v268_v23 = vadd.f32 %v267_v15, %v266_v12  ;;  %v295_v24 = vrot.slane %v294_v20, 4  ;;  %v321_v25 = vsel %vm320_vm4, %v319_v5, 0.0 }
  0x4a   : > { %v248_v26 = vrot.slane %v247_v18, 2  ;;  %v276_v27 = vrot.slane %v275_v19, 2  ;;  %v303_v28 = vadd.f32 %v302_v21, %v301_v17  ;;  %v322_v29 = vsel %vm208_vm0, %v321_v25, 0.0 }
  0x4b   : > { %v241_v30 = vrot.slane %v240_v22, 2  ;;  %v269_v31 = vrot.slane %v268_v23, 2  ;;  %v296_v32 = vadd.f32 %v295_v24, %v294_v20  ;;  %v323_v33 = vrot.slane %v322_v29, 4 }
  0x4c   : > { %v249_v34 = vadd.f32 %v248_v26, %v247_v18  ;;  %v277_v35 = vadd.f32 %v276_v27, %v275_v19  ;;  %v304_v36 = vrot.slane %v303_v28, 2  ;;  %v329_v37 = vsel %vm208_vm0, %v319_v5, 0.0 }
  0x4d   : > { %v242_v38 = vadd.f32 %v241_v30, %v240_v22  ;;  %v270_v39 = vadd.f32 %v269_v31, %v268_v23  ;;  %v297_v40 = vrot.slane %v296_v32, 2  ;;  %v324_v41 = vadd.f32 %v323_v33, %v322_v29 }
  0x4e   : > { %v250_v1 = vrot.slane %v249_v34, 1  ;;  %v278_v42 = vrot.slane %v277_v35, 1  ;;  %v305_v43 = vadd.f32 %v304_v36, %v303_v28  ;;  %v330_v44 = vrot.slane %v329_v37, 4 }
  0x4f   : > { %v243_v45 = vrot.slane %v242_v38, 1  ;;  %v271_v46 = vrot.slane %v270_v39, 1  ;;  %v298_v47 = vadd.f32 %v297_v40, %v296_v32  ;;  %v325_v48 = vrot.slane %v324_v41, 2 }
  0x50   : > { %v251_v49 = vadd.f32 %v250_v1, %v249_v34  ;;  %v279_v50 = vadd.f32 %v278_v42, %v277_v35  ;;  %v306_v51 = vrot.slane %v305_v43, 1  ;;  %v331_v52 = vadd.f32 %v330_v44, %v329_v37 }
  0x51   : > { %v244_v53 = vadd.f32 %v243_v45, %v242_v38  ;;  %v272_v54 = vadd.f32 %v271_v46, %v270_v39  ;;  %v299_v55 = vrot.slane %v298_v47, 1  ;;  %v326_v56 = vadd.f32 %v325_v48, %v324_v41 }
  0x52   : > { %261 = vst [vmem:[%s564_s23 + $0x4] sm:$0x1] %v251_v49  ;;  %289 = vst [vmem:[%s564_s23 + $0x5] sm:$0x1] %v279_v50  ;;  %v307_v57 = vadd.f32 %v306_v51, %v305_v43  ;;  %v332_v58 = vrot.slane %v331_v52, 2 }
  0x53   : > { %260 = vst [vmem:[%s564_s23] sm:$0x1] %v244_v53  ;;  %288 = vst [vmem:[%s564_s23 + $0x1] sm:$0x1] %v272_v54  ;;  %v300_v59 = vadd.f32 %v299_v55, %v298_v47  ;;  %v327_v60 = vrot.slane %v326_v56, 1 }
  0x54   : > { %317 = vst [vmem:[%s564_s23 + $0x6] sm:$0x1] %v307_v57  ;;  %v333_v61 = vadd.f32 %v332_v58, %v331_v52 }
  0x55   : > { %316 = vst [vmem:[%s564_s23 + $0x2] sm:$0x1] %v300_v59  ;;  %v328_v62 = vadd.f32 %v327_v60, %v326_v56 }
  0x56   : > { %v334_v63 = vrot.slane %v333_v61, 1 }
  0x57   : > { %344 = vst [vmem:[%s564_s23 + $0x3] sm:$0x1] %v328_v62 }
  0x58   : > { %v335_v0 = vadd.f32 %v334_v63, %v333_v61 }
  0x5a   : > { %345 = vst [vmem:[%s564_s23 + $0x7] sm:$0x1] %v335_v0 }
  0x5b PF: > { %s12_s11 = sadd.s32 1, %s519_s11   ;;  %s629_s9 = smov %s515_s10 }
  0x5c   : > { %p9_p5 = scmp.ge.s32.totalorder %s12_s11, 4   ;;  %s630_s10 = smov %s632_s12 }
  0x5e   :  { %11 = sbr.rel (!%p9_p5) target bundleno = 2 (0x2), region = 61 }

</bundles_post_ra>
